<compile_context>
chip_gen: v6e
topology: v6e:2x2x1
jax: 0.10.0
libtpu: 0.0.40
codegen_flags: <defaults>
</compile_context>

<pallas_src>
import functools

import jax
import jax.numpy as jnp
from jax.experimental import pallas as pl
from jax.experimental.pallas import tpu as pltpu


def _lstm_kernel(gx_ref, wh_ref, wf_ref, bf_ref, out_ref, h_sc, c_sc):
    """One grid step == one block of T_BLK LSTM time steps.

    gx_ref: (T_BLK, B, 4H) bf16  precomputed x@Wx + (bx+bh), gate order [i,f,o,g]
    wh_ref: (H, 4H)        bf16  h2h weight (transposed, reordered)
    wf_ref: (H, O)         bf16  fc weight (transposed)
    bf_ref: (1, O)         f32   fc bias
    out_ref:(B, O)         f32   written on the last grid step only
    h_sc, c_sc: (B, H) f32 VMEM scratch carrying the recurrent state
    """
    blk = pl.program_id(0)
    t_blk = gx_ref.shape[0]
    H = h_sc.shape[1]

    @pl.when(blk == 0)
    def _():
        h_sc[...] = jnp.zeros_like(h_sc)
        c_sc[...] = jnp.zeros_like(c_sc)

    wh = wh_ref[...]          # bf16 weights stay resident for the whole block
    h = h_sc[...]             # f32
    c = c_sc[...]             # f32

    # Serial recurrence: only h @ Wh + gate math is on the critical path.
    # t_blk is a trace-time constant -> static slices / fully unrolled loop;
    # the grid-step boundary bounds live ranges between blocks.
    for t in range(t_blk):
        gates = (gx_ref[t].astype(jnp.float32)
                 + jnp.dot(h.astype(jnp.bfloat16), wh,
                           preferred_element_type=jnp.float32))   # (B, 4H) f32
        sig = jax.nn.sigmoid(gates[:, : 3 * H])   # i | f | o in one EUP pass
        g = jnp.tanh(gates[:, 3 * H:])
        i_g = sig[:, 0 * H:1 * H]
        f_g = sig[:, 1 * H:2 * H]
        o_g = sig[:, 2 * H:3 * H]
        c = c * f_g + i_g * g                     # elementwise kept in f32
        h = o_g * jnp.tanh(c)

    h_sc[...] = h
    c_sc[...] = c

    # fc applied to the final hidden state only (matches PyTorch forward).
    @pl.when(blk == pl.num_programs(0) - 1)
    def _():
        out_ref[...] = (jnp.dot(h.astype(jnp.bfloat16), wf_ref[...],
                                preferred_element_type=jnp.float32)
                        + bf_ref[...])


def _pick_t_blk(T, B_pad, H, vmem_budget_bytes=24 * 1024 * 1024):
    """Largest divisor of T that is <= 64 and keeps the double-buffered gx
    block within the VMEM budget.  Falls back to 1 (grid == T) for prime T."""
    gx_step_bytes = B_pad * 4 * H * 2            # bf16 per time step
    max_t = max(1, vmem_budget_bytes // (2 * gx_step_bytes))
    cap = min(64, max_t, T)
    best = 1
    for d in range(1, cap + 1):
        if T % d == 0:
            best = d
    return best


@functools.partial(jax.jit, static_argnames=("t_blk",))
def lstm_model_forward(x, w_x2h, b_x2h, w_h2h, b_h2h, w_fc, b_fc, *, t_blk=None):
    """x: (B, T, D) f32 (batch_first, like PyTorch).  Parameters in PyTorch
    layout: w_x2h (4H, D), b_x2h (4H,), w_h2h (4H, H), b_h2h (4H,),
    w_fc (O, H), b_fc (O,).  Returns (B, O) f32."""
    B, T, D = x.shape
    H = w_h2h.shape[1]
    O = w_fc.shape[0]

    # ---- one-time parameter prep (tiny XLA ops) -----------------------------
    # Transpose for right-matmul, reorder gate columns [i,f,g,o] -> [i,f,o,g],
    # fold the two LSTM biases into one, cast weights to bf16 (MXU-native;
    # halves weight VMEM/DMA, which matters most on v7x's 64 MiB VMEM).
    def _reorder_t(w):                       # (4H, X) -> (X, 4H), order [i,f,o,g]
        wi, wff, wg, wo = jnp.split(w, 4, axis=0)
        return jnp.concatenate([wi, wff, wo, wg], axis=0).T

    wx = _reorder_t(w_x2h).astype(jnp.bfloat16)              # (D, 4H)
    wh = _reorder_t(w_h2h).astype(jnp.bfloat16)              # (H, 4H)
    bi, bff, bg, bo = jnp.split((b_x2h + b_h2h).astype(jnp.float32), 4)
    b = jnp.concatenate([bi, bff, bo, bg])[None, :]          # (1, 4H) f32
    wf = w_fc.T.astype(jnp.bfloat16)                         # (H, O)
    bfc = b_fc.astype(jnp.float32)[None, :]                  # (1, O)

    # ---- pad batch (MXU M dim / sublanes) up to a multiple of 8 -------------
    B_pad = max(8, ((B + 7) // 8) * 8)
    if B_pad != B:
        x = jnp.pad(x, ((0, B_pad - B), (0, 0), (0, 0)))

    # ---- hoisted input projection (time-parallel phase) ---------------------
    # One large MXU-efficient matmul replaces T tiny (B,D)x(D,4H) matmuls; the
    # 'tbg' output order gives the kernel time-major, tile-aligned per-step
    # slices with no separate HBM transpose of x.  bf16 storage halves the
    # HBM traffic streamed into the recurrence.
    gx = (jnp.einsum("btd,dg->tbg", x.astype(jnp.bfloat16), wx,
                     preferred_element_type=jnp.float32)
          + b).astype(jnp.bfloat16)                          # (T, B_pad, 4H)

    # ---- time blocking: amortize the ~0.35us per-grid-step overhead ---------
    if t_blk is None:
        t_blk = _pick_t_blk(T, B_pad, H)
    assert T % t_blk == 0, "t_blk must divide T"
    n_blk = T // t_blk
    # TODO(synk): for huge prime T a masked remainder block would beat t_blk=1.

    # ---- VMEM footprint -> limit request (valid on 64 MiB v7x as well) ------
    gx_blk_bytes = t_blk * B_pad * 4 * H * 2                 # bf16
    weight_bytes = (H * 4 * H + H * O) * 2 + O * 4
    state_bytes = 2 * B_pad * H * 4 + B_pad * O * 4
    needed = 2 * gx_blk_bytes + 2 * weight_bytes + state_bytes
    vmem_limit = int(min(max(2 * needed + (8 << 20), 32 << 20), 64 << 20))

    grid_spec = pltpu.PrefetchScalarGridSpec(
        num_scalar_prefetch=0,
        grid=(n_blk,),
        in_specs=[
            pl.BlockSpec((t_blk, B_pad, 4 * H), lambda i: (i, 0, 0)),  # XWx block
            # Weights/biases are grid-invariant (constant index_map) -> fetched
            # once.  NOTE: at production hidden sizes on v7x (64 MiB VMEM), add
            # pipeline_mode=pl.Buffered(1) on these specs to single-buffer them.
            pl.BlockSpec((H, 4 * H), lambda i: (0, 0)),                # Wh
            pl.BlockSpec((H, O), lambda i: (0, 0)),                    # W_fc
            pl.BlockSpec((1, O), lambda i: (0, 0)),                    # b_fc
        ],
        out_specs=pl.BlockSpec((B_pad, O), lambda i: (0, 0)),
        scratch_shapes=[
            pltpu.VMEM((B_pad, H), jnp.float32),   # h state (f32)
            pltpu.VMEM((B_pad, H), jnp.float32),   # c state (f32)
        ],
    )

    out = pl.pallas_call(
        _lstm_kernel,
        out_shape=jax.ShapeDtypeStruct((B_pad, O), jnp.float32),
        grid_spec=grid_spec,
        compiler_params=pltpu.CompilerParams(
            dimension_semantics=("arbitrary",),    # recurrence => sequential
            vmem_limit_bytes=vmem_limit,
        ),
    )(gx, wh, wf, bfc)
    return out[:B]


def _reference_forward(x, w_x2h, b_x2h, w_h2h, b_h2h, w_fc, b_fc):
    """Pure-JAX f32 reference mirroring the PyTorch module exactly."""
    B, T, D = x.shape
    H = w_h2h.shape[1]
    h = jnp.zeros((B, H), jnp.float32)
    c = jnp.zeros((B, H), jnp.float32)
    for t in range(T):
        gates = x[:, t, :] @ w_x2h.T + b_x2h + h @ w_h2h.T + b_h2h
        i = jax.nn.sigmoid(gates[:, 0 * H:1 * H])
        f = jax.nn.sigmoid(gates[:, 1 * H:2 * H])
        g = jnp.tanh(gates[:, 2 * H:3 * H])
        o = jax.nn.sigmoid(gates[:, 3 * H:4 * H])
        c = c * f + i * g
        h = o * jnp.tanh(c)
    return h @ w_fc.T + b_fc


if __name__ == "__main__":
    # Shapes consistent with LSTMModel(input_dim, hidden_dim, layer_dim=1, output_dim)
    B, T, D, H, O = 4, 8, 16, 32, 8

    key = jax.random.PRNGKey(0)
    k_x, k_wx, k_wh, k_wf, k_bf = jax.random.split(key, 5)

    std = 1.0 / (H ** 0.5)
    # LSTMCell.reset_parameters: weights ~ U(-std, std), biases = 0 (PyTorch layout).
    w_x2h = jax.random.uniform(k_wx, (4 * H, D), jnp.float32, -std, std)
    b_x2h = jnp.zeros((4 * H,), jnp.float32)
    w_h2h = jax.random.uniform(k_wh, (4 * H, H), jnp.float32, -std, std)
    b_h2h = jnp.zeros((4 * H,), jnp.float32)
    # fc = nn.Linear(H, O): weight (O, H), bias (O,).
    w_fc = jax.random.uniform(k_wf, (O, H), jnp.float32, -std, std)
    b_fc = jax.random.uniform(k_bf, (O,), jnp.float32, -std, std)

    x = jax.random.normal(k_x, (B, T, D), jnp.float32)

    out = lstm_model_forward(x, w_x2h, b_x2h, w_h2h, b_h2h, w_fc, b_fc)
    out = jax.block_until_ready(out)

    ref = _reference_forward(x, w_x2h, b_x2h, w_h2h, b_h2h, w_fc, b_fc)
    assert out.shape == (B, O)
    # bf16 matmul inputs (f32 accumulation) => loosened tolerance vs f32 reference.
    assert jnp.allclose(out, ref, atol=2e-2, rtol=2e-2), "mismatch vs reference"

    print("KERNEL_OK")
</pallas_src>

<mosaic_0001>
module attributes {stable_mosaic.version = 11 : i64} {
  func.func @_lstm_kernel(%arg0: i32, %arg1: memref<8x8x128xbf16, #tpu.memory_space<vmem>>, %arg2: memref<32x128xbf16, #tpu.memory_space<vmem>>, %arg3: memref<32x8xbf16, #tpu.memory_space<vmem>>, %arg4: memref<1x8xf32, #tpu.memory_space<vmem>>, %arg5: memref<8x8xf32, #tpu.memory_space<vmem>>, %arg6: memref<8x32xf32, #tpu.memory_space<vmem>>, %arg7: memref<8x32xf32, #tpu.memory_space<vmem>>) attributes {dimension_semantics = [#tpu.dimension_semantics<arbitrary>], iteration_bounds = array<i64: 1>, scalar_prefetch = 0 : i64, scratch_operands = 2 : i64, tpu.core_type = #tpu.core_type<tc>, window_params = [{transform_indices = @transform_0, window_bounds = array<i64: 8, 8, 128>}, {pipeline_mode = #tpu.pipeline_mode<synchronous>, transform_indices = @transform_1, window_bounds = array<i64: 32, 128>}, {pipeline_mode = #tpu.pipeline_mode<synchronous>, transform_indices = @transform_2, window_bounds = array<i64: 32, 8>}, {pipeline_mode = #tpu.pipeline_mode<synchronous>, transform_indices = @transform_3, window_bounds = array<i64: 1, 8>}, {pipeline_mode = #tpu.pipeline_mode<synchronous>, transform_indices = @transform_4, window_bounds = array<i64: 8, 8>}]} {
    %c0_i32 = arith.constant 0 : i32
    %0 = arith.cmpi eq, %arg0, %c0_i32 : i32
    %1 = arith.extui %0 : i1 to i32
    %c0_i32_0 = arith.constant 0 : i32
    %2 = arith.cmpi ne, %1, %c0_i32_0 : i32
    scf.if %2 {
      %cst_44 = arith.constant 0.000000e+00 : f32
      %187 = vector.broadcast %cst_44 : f32 to vector<8x32xf32>
      %c0_45 = arith.constant 0 : index
      %c0_46 = arith.constant 0 : index
      %188 = vector.load %arg6[%c0_45, %c0_46] : memref<8x32xf32, #tpu.memory_space<vmem>>, vector<8x32xf32>
      tpu.vector_store %arg6[%c0_45, %c0_46], %187 {strides = array<i32>} : memref<8x32xf32, #tpu.memory_space<vmem>>, vector<8x32xf32>,
      %cst_47 = arith.constant 0.000000e+00 : f32
      %189 = vector.broadcast %cst_47 : f32 to vector<8x32xf32>
      %c0_48 = arith.constant 0 : index
      %c0_49 = arith.constant 0 : index
      %190 = vector.load %arg7[%c0_48, %c0_49] : memref<8x32xf32, #tpu.memory_space<vmem>>, vector<8x32xf32>
      tpu.vector_store %arg7[%c0_48, %c0_49], %189 {strides = array<i32>} : memref<8x32xf32, #tpu.memory_space<vmem>>, vector<8x32xf32>,
    } else {
    }
    %c0 = arith.constant 0 : index
    %c0_1 = arith.constant 0 : index
    %3 = vector.load %arg2[%c0, %c0_1] : memref<32x128xbf16, #tpu.memory_space<vmem>>, vector<32x128xbf16>
    %c0_2 = arith.constant 0 : index
    %c0_3 = arith.constant 0 : index
    %4 = vector.load %arg6[%c0_2, %c0_3] : memref<8x32xf32, #tpu.memory_space<vmem>>, vector<8x32xf32>
    %c0_4 = arith.constant 0 : index
    %c0_5 = arith.constant 0 : index
    %5 = vector.load %arg7[%c0_4, %c0_5] : memref<8x32xf32, #tpu.memory_space<vmem>>, vector<8x32xf32>
    %c0_6 = arith.constant 0 : index
    %c0_7 = arith.constant 0 : index
    %c0_8 = arith.constant 0 : index
    %6 = vector.load %arg1[%c0_6, %c0_7, %c0_8] : memref<8x8x128xbf16, #tpu.memory_space<vmem>>, vector<1x8x128xbf16>
    %7 = vector.shape_cast %6 : vector<1x8x128xbf16> to vector<8x128xbf16>
    %8 = arith.extf %7 : vector<8x128xbf16> to vector<8x128xf32>
    %9 = arith.truncf %4 : vector<8x32xf32> to vector<8x32xbf16>
    %cst = arith.constant dense<0.000000e+00> : vector<8x128xf32>
    %10 = tpu.matmul %9, %3, %cst {dimension_numbers = #tpu.dot_dimension_numbers<[1], [0], [0], [1], [0, 0, 1, 1], [], []>} : vector<8x32xbf16>, vector<32x128xbf16>, vector<8x128xf32> -> vector<8x128xf32>
    %11 = arith.addf %8, %10 : vector<8x128xf32>
    %12 = vector.extract_strided_slice %11 {offsets = [0, 0], sizes = [8, 96], strides = [1, 1]} : vector<8x128xf32> to vector<8x96xf32>
    %13 = arith.negf %12 : vector<8x96xf32>
    %14 = math.exp %13 : vector<8x96xf32>
    %cst_9 = arith.constant 1.000000e+00 : f32
    %15 = vector.broadcast %cst_9 : f32 to vector<8x96xf32>
    %16 = arith.addf %15, %14 : vector<8x96xf32>
    %17 = arith.divf %15, %16 : vector<8x96xf32>
    %18 = vector.extract_strided_slice %11 {offsets = [0, 96], sizes = [8, 32], strides = [1, 1]} : vector<8x128xf32> to vector<8x32xf32>
    %19 = math.tanh %18 : vector<8x32xf32>
    %20 = vector.extract_strided_slice %17 {offsets = [0, 0], sizes = [8, 32], strides = [1, 1]} : vector<8x96xf32> to vector<8x32xf32>
    %21 = vector.extract_strided_slice %17 {offsets = [0, 32], sizes = [8, 32], strides = [1, 1]} : vector<8x96xf32> to vector<8x32xf32>
    %22 = vector.extract_strided_slice %17 {offsets = [0, 64], sizes = [8, 32], strides = [1, 1]} : vector<8x96xf32> to vector<8x32xf32>
    %23 = arith.mulf %5, %21 : vector<8x32xf32>
    %24 = arith.mulf %20, %19 : vector<8x32xf32>
    %25 = arith.addf %23, %24 : vector<8x32xf32>
    %26 = math.tanh %25 : vector<8x32xf32>
    %27 = arith.mulf %22, %26 : vector<8x32xf32>
    %c1 = arith.constant 1 : index
    %c0_10 = arith.constant 0 : index
    %c0_11 = arith.constant 0 : index
    %28 = vector.load %arg1[%c1, %c0_10, %c0_11] : memref<8x8x128xbf16, #tpu.memory_space<vmem>>, vector<1x8x128xbf16>
    %29 = vector.shape_cast %28 : vector<1x8x128xbf16> to vector<8x128xbf16>
    %30 = arith.extf %29 : vector<8x128xbf16> to vector<8x128xf32>
    %31 = arith.truncf %27 : vector<8x32xf32> to vector<8x32xbf16>
    %cst_12 = arith.constant dense<0.000000e+00> : vector<8x128xf32>
    %32 = tpu.matmul %31, %3, %cst_12 {dimension_numbers = #tpu.dot_dimension_numbers<[1], [0], [0], [1], [0, 0, 1, 1], [], []>} : vector<8x32xbf16>, vector<32x128xbf16>, vector<8x128xf32> -> vector<8x128xf32>
    %33 = arith.addf %30, %32 : vector<8x128xf32>
    %34 = vector.extract_strided_slice %33 {offsets = [0, 0], sizes = [8, 96], strides = [1, 1]} : vector<8x128xf32> to vector<8x96xf32>
    %35 = arith.negf %34 : vector<8x96xf32>
    %36 = math.exp %35 : vector<8x96xf32>
    %cst_13 = arith.constant 1.000000e+00 : f32
    %37 = vector.broadcast %cst_13 : f32 to vector<8x96xf32>
    %38 = arith.addf %37, %36 : vector<8x96xf32>
    %39 = arith.divf %37, %38 : vector<8x96xf32>
    %40 = vector.extract_strided_slice %33 {offsets = [0, 96], sizes = [8, 32], strides = [1, 1]} : vector<8x128xf32> to vector<8x32xf32>
    %41 = math.tanh %40 : vector<8x32xf32>
    %42 = vector.extract_strided_slice %39 {offsets = [0, 0], sizes = [8, 32], strides = [1, 1]} : vector<8x96xf32> to vector<8x32xf32>
    %43 = vector.extract_strided_slice %39 {offsets = [0, 32], sizes = [8, 32], strides = [1, 1]} : vector<8x96xf32> to vector<8x32xf32>
    %44 = vector.extract_strided_slice %39 {offsets = [0, 64], sizes = [8, 32], strides = [1, 1]} : vector<8x96xf32> to vector<8x32xf32>
    %45 = arith.mulf %25, %43 : vector<8x32xf32>
    %46 = arith.mulf %42, %41 : vector<8x32xf32>
    %47 = arith.addf %45, %46 : vector<8x32xf32>
    %48 = math.tanh %47 : vector<8x32xf32>
    %49 = arith.mulf %44, %48 : vector<8x32xf32>
    %c2 = arith.constant 2 : index
    %c0_14 = arith.constant 0 : index
    %c0_15 = arith.constant 0 : index
    %50 = vector.load %arg1[%c2, %c0_14, %c0_15] : memref<8x8x128xbf16, #tpu.memory_space<vmem>>, vector<1x8x128xbf16>
    %51 = vector.shape_cast %50 : vector<1x8x128xbf16> to vector<8x128xbf16>
    %52 = arith.extf %51 : vector<8x128xbf16> to vector<8x128xf32>
    %53 = arith.truncf %49 : vector<8x32xf32> to vector<8x32xbf16>
    %cst_16 = arith.constant dense<0.000000e+00> : vector<8x128xf32>
    %54 = tpu.matmul %53, %3, %cst_16 {dimension_numbers = #tpu.dot_dimension_numbers<[1], [0], [0], [1], [0, 0, 1, 1], [], []>} : vector<8x32xbf16>, vector<32x128xbf16>, vector<8x128xf32> -> vector<8x128xf32>
    %55 = arith.addf %52, %54 : vector<8x128xf32>
    %56 = vector.extract_strided_slice %55 {offsets = [0, 0], sizes = [8, 96], strides = [1, 1]} : vector<8x128xf32> to vector<8x96xf32>
    %57 = arith.negf %56 : vector<8x96xf32>
    %58 = math.exp %57 : vector<8x96xf32>
    %cst_17 = arith.constant 1.000000e+00 : f32
    %59 = vector.broadcast %cst_17 : f32 to vector<8x96xf32>
    %60 = arith.addf %59, %58 : vector<8x96xf32>
    %61 = arith.divf %59, %60 : vector<8x96xf32>
    %62 = vector.extract_strided_slice %55 {offsets = [0, 96], sizes = [8, 32], strides = [1, 1]} : vector<8x128xf32> to vector<8x32xf32>
    %63 = math.tanh %62 : vector<8x32xf32>
    %64 = vector.extract_strided_slice %61 {offsets = [0, 0], sizes = [8, 32], strides = [1, 1]} : vector<8x96xf32> to vector<8x32xf32>
    %65 = vector.extract_strided_slice %61 {offsets = [0, 32], sizes = [8, 32], strides = [1, 1]} : vector<8x96xf32> to vector<8x32xf32>
    %66 = vector.extract_strided_slice %61 {offsets = [0, 64], sizes = [8, 32], strides = [1, 1]} : vector<8x96xf32> to vector<8x32xf32>
    %67 = arith.mulf %47, %65 : vector<8x32xf32>
    %68 = arith.mulf %64, %63 : vector<8x32xf32>
    %69 = arith.addf %67, %68 : vector<8x32xf32>
    %70 = math.tanh %69 : vector<8x32xf32>
    %71 = arith.mulf %66, %70 : vector<8x32xf32>
    %c3 = arith.constant 3 : index
    %c0_18 = arith.constant 0 : index
    %c0_19 = arith.constant 0 : index
    %72 = vector.load %arg1[%c3, %c0_18, %c0_19] : memref<8x8x128xbf16, #tpu.memory_space<vmem>>, vector<1x8x128xbf16>
    %73 = vector.shape_cast %72 : vector<1x8x128xbf16> to vector<8x128xbf16>
    %74 = arith.extf %73 : vector<8x128xbf16> to vector<8x128xf32>
    %75 = arith.truncf %71 : vector<8x32xf32> to vector<8x32xbf16>
    %cst_20 = arith.constant dense<0.000000e+00> : vector<8x128xf32>
    %76 = tpu.matmul %75, %3, %cst_20 {dimension_numbers = #tpu.dot_dimension_numbers<[1], [0], [0], [1], [0, 0, 1, 1], [], []>} : vector<8x32xbf16>, vector<32x128xbf16>, vector<8x128xf32> -> vector<8x128xf32>
    %77 = arith.addf %74, %76 : vector<8x128xf32>
    %78 = vector.extract_strided_slice %77 {offsets = [0, 0], sizes = [8, 96], strides = [1, 1]} : vector<8x128xf32> to vector<8x96xf32>
    %79 = arith.negf %78 : vector<8x96xf32>
    %80 = math.exp %79 : vector<8x96xf32>
    %cst_21 = arith.constant 1.000000e+00 : f32
    %81 = vector.broadcast %cst_21 : f32 to vector<8x96xf32>
    %82 = arith.addf %81, %80 : vector<8x96xf32>
    %83 = arith.divf %81, %82 : vector<8x96xf32>
    %84 = vector.extract_strided_slice %77 {offsets = [0, 96], sizes = [8, 32], strides = [1, 1]} : vector<8x128xf32> to vector<8x32xf32>
    %85 = math.tanh %84 : vector<8x32xf32>
    %86 = vector.extract_strided_slice %83 {offsets = [0, 0], sizes = [8, 32], strides = [1, 1]} : vector<8x96xf32> to vector<8x32xf32>
    %87 = vector.extract_strided_slice %83 {offsets = [0, 32], sizes = [8, 32], strides = [1, 1]} : vector<8x96xf32> to vector<8x32xf32>
    %88 = vector.extract_strided_slice %83 {offsets = [0, 64], sizes = [8, 32], strides = [1, 1]} : vector<8x96xf32> to vector<8x32xf32>
    %89 = arith.mulf %69, %87 : vector<8x32xf32>
    %90 = arith.mulf %86, %85 : vector<8x32xf32>
    %91 = arith.addf %89, %90 : vector<8x32xf32>
    %92 = math.tanh %91 : vector<8x32xf32>
    %93 = arith.mulf %88, %92 : vector<8x32xf32>
    %c4 = arith.constant 4 : index
    %c0_22 = arith.constant 0 : index
    %c0_23 = arith.constant 0 : index
    %94 = vector.load %arg1[%c4, %c0_22, %c0_23] : memref<8x8x128xbf16, #tpu.memory_space<vmem>>, vector<1x8x128xbf16>
    %95 = vector.shape_cast %94 : vector<1x8x128xbf16> to vector<8x128xbf16>
    %96 = arith.extf %95 : vector<8x128xbf16> to vector<8x128xf32>
    %97 = arith.truncf %93 : vector<8x32xf32> to vector<8x32xbf16>
    %cst_24 = arith.constant dense<0.000000e+00> : vector<8x128xf32>
    %98 = tpu.matmul %97, %3, %cst_24 {dimension_numbers = #tpu.dot_dimension_numbers<[1], [0], [0], [1], [0, 0, 1, 1], [], []>} : vector<8x32xbf16>, vector<32x128xbf16>, vector<8x128xf32> -> vector<8x128xf32>
    %99 = arith.addf %96, %98 : vector<8x128xf32>
    %100 = vector.extract_strided_slice %99 {offsets = [0, 0], sizes = [8, 96], strides = [1, 1]} : vector<8x128xf32> to vector<8x96xf32>
    %101 = arith.negf %100 : vector<8x96xf32>
    %102 = math.exp %101 : vector<8x96xf32>
    %cst_25 = arith.constant 1.000000e+00 : f32
    %103 = vector.broadcast %cst_25 : f32 to vector<8x96xf32>
    %104 = arith.addf %103, %102 : vector<8x96xf32>
    %105 = arith.divf %103, %104 : vector<8x96xf32>
    %106 = vector.extract_strided_slice %99 {offsets = [0, 96], sizes = [8, 32], strides = [1, 1]} : vector<8x128xf32> to vector<8x32xf32>
    %107 = math.tanh %106 : vector<8x32xf32>
    %108 = vector.extract_strided_slice %105 {offsets = [0, 0], sizes = [8, 32], strides = [1, 1]} : vector<8x96xf32> to vector<8x32xf32>
    %109 = vector.extract_strided_slice %105 {offsets = [0, 32], sizes = [8, 32], strides = [1, 1]} : vector<8x96xf32> to vector<8x32xf32>
    %110 = vector.extract_strided_slice %105 {offsets = [0, 64], sizes = [8, 32], strides = [1, 1]} : vector<8x96xf32> to vector<8x32xf32>
    %111 = arith.mulf %91, %109 : vector<8x32xf32>
    %112 = arith.mulf %108, %107 : vector<8x32xf32>
    %113 = arith.addf %111, %112 : vector<8x32xf32>
    %114 = math.tanh %113 : vector<8x32xf32>
    %115 = arith.mulf %110, %114 : vector<8x32xf32>
    %c5 = arith.constant 5 : index
    %c0_26 = arith.constant 0 : index
    %c0_27 = arith.constant 0 : index
    %116 = vector.load %arg1[%c5, %c0_26, %c0_27] : memref<8x8x128xbf16, #tpu.memory_space<vmem>>, vector<1x8x128xbf16>
    %117 = vector.shape_cast %116 : vector<1x8x128xbf16> to vector<8x128xbf16>
    %118 = arith.extf %117 : vector<8x128xbf16> to vector<8x128xf32>
    %119 = arith.truncf %115 : vector<8x32xf32> to vector<8x32xbf16>
    %cst_28 = arith.constant dense<0.000000e+00> : vector<8x128xf32>
    %120 = tpu.matmul %119, %3, %cst_28 {dimension_numbers = #tpu.dot_dimension_numbers<[1], [0], [0], [1], [0, 0, 1, 1], [], []>} : vector<8x32xbf16>, vector<32x128xbf16>, vector<8x128xf32> -> vector<8x128xf32>
    %121 = arith.addf %118, %120 : vector<8x128xf32>
    %122 = vector.extract_strided_slice %121 {offsets = [0, 0], sizes = [8, 96], strides = [1, 1]} : vector<8x128xf32> to vector<8x96xf32>
    %123 = arith.negf %122 : vector<8x96xf32>
    %124 = math.exp %123 : vector<8x96xf32>
    %cst_29 = arith.constant 1.000000e+00 : f32
    %125 = vector.broadcast %cst_29 : f32 to vector<8x96xf32>
    %126 = arith.addf %125, %124 : vector<8x96xf32>
    %127 = arith.divf %125, %126 : vector<8x96xf32>
    %128 = vector.extract_strided_slice %121 {offsets = [0, 96], sizes = [8, 32], strides = [1, 1]} : vector<8x128xf32> to vector<8x32xf32>
    %129 = math.tanh %128 : vector<8x32xf32>
    %130 = vector.extract_strided_slice %127 {offsets = [0, 0], sizes = [8, 32], strides = [1, 1]} : vector<8x96xf32> to vector<8x32xf32>
    %131 = vector.extract_strided_slice %127 {offsets = [0, 32], sizes = [8, 32], strides = [1, 1]} : vector<8x96xf32> to vector<8x32xf32>
    %132 = vector.extract_strided_slice %127 {offsets = [0, 64], sizes = [8, 32], strides = [1, 1]} : vector<8x96xf32> to vector<8x32xf32>
    %133 = arith.mulf %113, %131 : vector<8x32xf32>
    %134 = arith.mulf %130, %129 : vector<8x32xf32>
    %135 = arith.addf %133, %134 : vector<8x32xf32>
    %136 = math.tanh %135 : vector<8x32xf32>
    %137 = arith.mulf %132, %136 : vector<8x32xf32>
    %c6 = arith.constant 6 : index
    %c0_30 = arith.constant 0 : index
    %c0_31 = arith.constant 0 : index
    %138 = vector.load %arg1[%c6, %c0_30, %c0_31] : memref<8x8x128xbf16, #tpu.memory_space<vmem>>, vector<1x8x128xbf16>
    %139 = vector.shape_cast %138 : vector<1x8x128xbf16> to vector<8x128xbf16>
    %140 = arith.extf %139 : vector<8x128xbf16> to vector<8x128xf32>
    %141 = arith.truncf %137 : vector<8x32xf32> to vector<8x32xbf16>
    %cst_32 = arith.constant dense<0.000000e+00> : vector<8x128xf32>
    %142 = tpu.matmul %141, %3, %cst_32 {dimension_numbers = #tpu.dot_dimension_numbers<[1], [0], [0], [1], [0, 0, 1, 1], [], []>} : vector<8x32xbf16>, vector<32x128xbf16>, vector<8x128xf32> -> vector<8x128xf32>
    %143 = arith.addf %140, %142 : vector<8x128xf32>
    %144 = vector.extract_strided_slice %143 {offsets = [0, 0], sizes = [8, 96], strides = [1, 1]} : vector<8x128xf32> to vector<8x96xf32>
    %145 = arith.negf %144 : vector<8x96xf32>
    %146 = math.exp %145 : vector<8x96xf32>
    %cst_33 = arith.constant 1.000000e+00 : f32
    %147 = vector.broadcast %cst_33 : f32 to vector<8x96xf32>
    %148 = arith.addf %147, %146 : vector<8x96xf32>
    %149 = arith.divf %147, %148 : vector<8x96xf32>
    %150 = vector.extract_strided_slice %143 {offsets = [0, 96], sizes = [8, 32], strides = [1, 1]} : vector<8x128xf32> to vector<8x32xf32>
    %151 = math.tanh %150 : vector<8x32xf32>
    %152 = vector.extract_strided_slice %149 {offsets = [0, 0], sizes = [8, 32], strides = [1, 1]} : vector<8x96xf32> to vector<8x32xf32>
    %153 = vector.extract_strided_slice %149 {offsets = [0, 32], sizes = [8, 32], strides = [1, 1]} : vector<8x96xf32> to vector<8x32xf32>
    %154 = vector.extract_strided_slice %149 {offsets = [0, 64], sizes = [8, 32], strides = [1, 1]} : vector<8x96xf32> to vector<8x32xf32>
    %155 = arith.mulf %135, %153 : vector<8x32xf32>
    %156 = arith.mulf %152, %151 : vector<8x32xf32>
    %157 = arith.addf %155, %156 : vector<8x32xf32>
    %158 = math.tanh %157 : vector<8x32xf32>
    %159 = arith.mulf %154, %158 : vector<8x32xf32>
    %c7 = arith.constant 7 : index
    %c0_34 = arith.constant 0 : index
    %c0_35 = arith.constant 0 : index
    %160 = vector.load %arg1[%c7, %c0_34, %c0_35] : memref<8x8x128xbf16, #tpu.memory_space<vmem>>, vector<1x8x128xbf16>
    %161 = vector.shape_cast %160 : vector<1x8x128xbf16> to vector<8x128xbf16>
    %162 = arith.extf %161 : vector<8x128xbf16> to vector<8x128xf32>
    %163 = arith.truncf %159 : vector<8x32xf32> to vector<8x32xbf16>
    %cst_36 = arith.constant dense<0.000000e+00> : vector<8x128xf32>
    %164 = tpu.matmul %163, %3, %cst_36 {dimension_numbers = #tpu.dot_dimension_numbers<[1], [0], [0], [1], [0, 0, 1, 1], [], []>} : vector<8x32xbf16>, vector<32x128xbf16>, vector<8x128xf32> -> vector<8x128xf32>
    %165 = arith.addf %162, %164 : vector<8x128xf32>
    %166 = vector.extract_strided_slice %165 {offsets = [0, 0], sizes = [8, 96], strides = [1, 1]} : vector<8x128xf32> to vector<8x96xf32>
    %167 = arith.negf %166 : vector<8x96xf32>
    %168 = math.exp %167 : vector<8x96xf32>
    %cst_37 = arith.constant 1.000000e+00 : f32
    %169 = vector.broadcast %cst_37 : f32 to vector<8x96xf32>
    %170 = arith.addf %169, %168 : vector<8x96xf32>
    %171 = arith.divf %169, %170 : vector<8x96xf32>
    %172 = vector.extract_strided_slice %165 {offsets = [0, 96], sizes = [8, 32], strides = [1, 1]} : vector<8x128xf32> to vector<8x32xf32>
    %173 = math.tanh %172 : vector<8x32xf32>
    %174 = vector.extract_strided_slice %171 {offsets = [0, 0], sizes = [8, 32], strides = [1, 1]} : vector<8x96xf32> to vector<8x32xf32>
    %175 = vector.extract_strided_slice %171 {offsets = [0, 32], sizes = [8, 32], strides = [1, 1]} : vector<8x96xf32> to vector<8x32xf32>
    %176 = vector.extract_strided_slice %171 {offsets = [0, 64], sizes = [8, 32], strides = [1, 1]} : vector<8x96xf32> to vector<8x32xf32>
    %177 = arith.mulf %157, %175 : vector<8x32xf32>
    %178 = arith.mulf %174, %173 : vector<8x32xf32>
    %179 = arith.addf %177, %178 : vector<8x32xf32>
    %180 = math.tanh %179 : vector<8x32xf32>
    %181 = arith.mulf %176, %180 : vector<8x32xf32>
    %c0_38 = arith.constant 0 : index
    %c0_39 = arith.constant 0 : index
    %182 = vector.load %arg6[%c0_38, %c0_39] : memref<8x32xf32, #tpu.memory_space<vmem>>, vector<8x32xf32>
    tpu.vector_store %arg6[%c0_38, %c0_39], %181 {strides = array<i32>} : memref<8x32xf32, #tpu.memory_space<vmem>>, vector<8x32xf32>,
    %c0_40 = arith.constant 0 : index
    %c0_41 = arith.constant 0 : index
    %183 = vector.load %arg7[%c0_40, %c0_41] : memref<8x32xf32, #tpu.memory_space<vmem>>, vector<8x32xf32>
    tpu.vector_store %arg7[%c0_40, %c0_41], %179 {strides = array<i32>} : memref<8x32xf32, #tpu.memory_space<vmem>>, vector<8x32xf32>,
    %c0_i32_42 = arith.constant 0 : i32
    %184 = arith.cmpi eq, %arg0, %c0_i32_42 : i32
    %185 = arith.extui %184 : i1 to i32
    %c0_i32_43 = arith.constant 0 : i32
    %186 = arith.cmpi ne, %185, %c0_i32_43 : i32
    scf.if %186 {
      %187 = arith.truncf %181 : vector<8x32xf32> to vector<8x32xbf16>
      %c0_44 = arith.constant 0 : index
      %c0_45 = arith.constant 0 : index
      %188 = vector.load %arg3[%c0_44, %c0_45] : memref<32x8xbf16, #tpu.memory_space<vmem>>, vector<32x8xbf16>
      %cst_46 = arith.constant dense<0.000000e+00> : vector<8x8xf32>
      %189 = tpu.matmul %187, %188, %cst_46 {dimension_numbers = #tpu.dot_dimension_numbers<[1], [0], [0], [1], [0, 0, 1, 1], [], []>} : vector<8x32xbf16>, vector<32x8xbf16>, vector<8x8xf32> -> vector<8x8xf32>
      %c0_47 = arith.constant 0 : index
      %c0_48 = arith.constant 0 : index
      %190 = vector.load %arg4[%c0_47, %c0_48] : memref<1x8xf32, #tpu.memory_space<vmem>>, vector<1x8xf32>
      %191 = vector.broadcast %190 : vector<1x8xf32> to vector<8x8xf32>
      %192 = arith.addf %189, %191 : vector<8x8xf32>
      %c0_49 = arith.constant 0 : index
      %c0_50 = arith.constant 0 : index
      %193 = vector.load %arg5[%c0_49, %c0_50] : memref<8x8xf32, #tpu.memory_space<vmem>>, vector<8x8xf32>
      tpu.vector_store %arg5[%c0_49, %c0_50], %192 {strides = array<i32>} : memref<8x8xf32, #tpu.memory_space<vmem>>, vector<8x8xf32>,
    } else {
    }
    return
  }
  func.func @transform_0(%arg0: i32) -> (i32, i32, i32) {
    %c0_i32 = arith.constant 0 : i32
    %c0_i32_0 = arith.constant 0 : i32
    %c0_i32_1 = arith.constant 0 : i32
    return %arg0, %c0_i32, %c0_i32_0 : i32, i32, i32
  }
  func.func @transform_1(%arg0: i32) -> (i32, i32) {
    %c0_i32 = arith.constant 0 : i32
    %c0_i32_0 = arith.constant 0 : i32
    %c0_i32_1 = arith.constant 0 : i32
    return %c0_i32, %c0_i32_0 : i32, i32
  }
  func.func @transform_2(%arg0: i32) -> (i32, i32) {
    %c0_i32 = arith.constant 0 : i32
    %c0_i32_0 = arith.constant 0 : i32
    %c0_i32_1 = arith.constant 0 : i32
    return %c0_i32, %c0_i32_0 : i32, i32
  }
  func.func @transform_3(%arg0: i32) -> (i32, i32) {
    %c0_i32 = arith.constant 0 : i32
    %c0_i32_0 = arith.constant 0 : i32
    %c0_i32_1 = arith.constant 0 : i32
    return %c0_i32, %c0_i32_0 : i32, i32
  }
  func.func @transform_4(%arg0: i32) -> (i32, i32) {
    %c0_i32 = arith.constant 0 : i32
    %c0_i32_0 = arith.constant 0 : i32
    %c0_i32_1 = arith.constant 0 : i32
    return %c0_i32, %c0_i32_0 : i32, i32
  }
}

</mosaic_0001>

<bundles_post_ra>
// kernel: lstm_model_forward.1
= control target key start
LH: loop header
LB: loop body
LE: loop exit
PB: predicated region body
PF: predicated region fallthrough
CT: control target
= control target key end

     0   :  { %vm22_vm0 = vcmask 261120   ;;  %v926_v0 = vmov 0.0   ;;  %vm927_vm1 = vmmov 0   ;;  %s928_s20 = smov 96   ;;  %s929_s21 = smov 32   ;;  %vm719_vm2 = vcmask 64512   ;;  %s1090_s1 = inlined_call_operand.vmem [shape: bf16[32,128], index: 1, kind: input, shape index: {}]   ;;  %s1091_s0 = inlined_call_operand.vmem [shape: bf16[8,8,128], index: 0, kind: input, shape index: {}]   ;;  %s1092_s2 = inlined_call_operand.vmem [shape: bf16[32,8], index: 2, kind: input, shape index: {}]   ;;  %s1093_s3 = inlined_call_operand.vmem [shape: f32[1,8], index: 3, kind: input, shape index: {}]   ;;  %s1094_s4 = inlined_call_operand.vmem [shape: f32[8,8], index: 4, kind: output, shape index: {}]  }
   0x1   :  { %781 = vmatprep.subr.bf16.mxu0 %v926_v0  ;;  %v960_v1 = vld [vmem:[%s1090_s1 + $0x8] sm:$0xff]   ;;  %785 = vmatprep.mubr.msk.bf16.mxu0 %vm927_vm1, %v926_v0  ;;  %23 = vst.msk [vmem:[#allocation2] sm:$0xff] %vm22_vm0, %v926_v0  ;;  %24 = vst.msk [vmem:[#allocation3] sm:$0xff] %vm22_vm0, %v926_v0  ;;  %v975_v2 = vld [vmem:[%s1090_s1] sm:$0xff]   ;;  %s930_s22 = smov 64  }
   0x2   :  { %789 = vmatprep.subr.bf16.mxu1 %v926_v0  ;;  %793 = vmatprep.mubr.msk.bf16.mxu1 %vm927_vm1, %v926_v0  ;;  %v31_v5 = vld [vmem:[%s1091_s0] sm:$0xff]   ;;  %v732_v49 = vld [vmem:[%s1091_s0 + $0x8] sm:$0xff]  }
   0x3   :  { %782 = vmatpush3.bf16.msra.mxu0 %v960_v1  ;;  %790 = vmatpush3.bf16.msra.mxu1 %v960_v1  ;;  %v32_v6 = vunpack.c.l.bf16 %v31_v5  ;;  %v117_v28 = vunpack.c.h.bf16 %v31_v5  ;;  %v192_v50 = vunpack.c.l.bf16 %v732_v49 }
   0x4   :  { %783 = vmatprep.subr.bf16.mxu0 %v926_v0  ;;  %791 = vmatprep.subr.bf16.mxu1 %v926_v0 }
   0x7   :  { %784 = vmatpush3.bf16.msra.mxu0 %v975_v2  ;;  %792 = vmatpush3.bf16.msra.mxu1 %v975_v2 }
   0x8   :  { %v29_v3 = vld [vmem:[#allocation2] sm:$0xff]  ;;  %797 = vmatprep.subr.bf16.mxu0 %v926_v0  ;;  %805 = vmatprep.subr.bf16.mxu1 %v926_v0  ;;  %v30_v18 = vld [vmem:[#allocation3] sm:$0xff] }
   0x9   :  { %v33_v4 = vpack.c.bf16 %v29_v3, %v29_v3 }
   0xb   :  { %786 = vmatmul.mubr.msk.bf16.vlgmr.msra.gmra.mxu0 %vm22_vm0, %v33_v4 }
   0xc   :  { %798 = vmatpush3.bf16.msra.mxu0 %v960_v1  ;;  %801 = vmatprep.mubr.msk.bf16.mxu0 %vm927_vm1, %v926_v0 }
   0xd   :  { %799 = vmatprep.subr.bf16.mxu0 %v926_v0 }
  0x10   :  { %800 = vmatpush3.bf16.msra.mxu0 %v975_v2 }
  0x11   :  { %813 = vmatprep.subr.bf16.mxu0 %v926_v0 }
  0xcb   :  { %v84_v7 = vpop.f32.mrf.mxu0 }
  0xcc   :  { %v90_v8 = vadd.f32 %v84_v7, %v32_v6 }
  0xcd   :  { %v787_v9 = vpop.f32.mrf.mxu0 }
  0xce   :  { %v728_v10 = vmul.f32 -1.442695, %v90_v8 }
  0xcf   :  { %v87_v11 = vpop.f32.mrf.mxu0 }
  0xd0   :  { %862 = vpow2.f32 %v728_v10  ;;  %v267_v10 = vunpack.c.h.bf16 %v732_v49 }
  0xd1   :  { %v788_v12 = vpop.f32.mrf.mxu0 }
  0xdd   :  { %v863_v13 = vpop.eup %862 }
  0xde   :  { %v94_v14 = vadd.f32 1.0, %v863_v13 }
  0xe0   :  { %864 = vrcp.f32 %v94_v14 }
  0xe1   :  { %866 = vtanh.f32 %v90_v8 }
  0xed   :  { %v865_v15 = vpop.eup %864 }
  0xee   :  { %99 = vrot.lane.b32.xlu0 %v865_v15, %s928_s20  ;;  %v867_v16 = vpop.eup %866 }
  0xf2   :  { %104 = vrot.lane.b32.xlu0 %v867_v16, %s929_s21 }
 0x160   :  { %v100_v17 = vpop.permute.xlu0 %99 }
 0x161   :  { %v102_v20 = vmul.f32 %v100_v17, %v30_v18 }
 0x164   :  { %v105_v19 = vpop.permute.xlu0 %104 }
 0x165   :  { %v107_v21 = vmul.f32 %v865_v15, %v105_v19 }
 0x167   :  { %v108_v22 = vadd.f32 %v107_v21, %v102_v20 }
 0x169   :  { %868 = vtanh.f32 %v108_v22 }
 0x176   :  { %v869_v23 = vpop.eup %868 }
 0x177   :  { %111 = vrot.lane.b32.xlu1 %v869_v23, %s930_s22 }
 0x1e9   :  { %v112_v24 = vpop.permute.xlu1 %111 }
 0x1ea   :  { %v114_v25 = vmul.f32 %v865_v15, %v112_v24 }
 0x1ec   :  { %v118_v26 = vpack.c.bf16 %v114_v25, %v114_v25 }
 0x1ee   :  { %120 = vrot.lane.b32.xlu1 %v118_v26, %s930_s22 }
 0x260   :  { %v121_v27 = vpop.permute.xlu1 %120 }
 0x261   :  { %794 = vmatmul.mubr.msk.bf16.vlgmr.msra.gmra.mxu1 %vm22_vm0, %v121_v27 }
 0x262   :  { %806 = vmatpush3.bf16.msra.mxu1 %v960_v1  ;;  %809 = vmatprep.mubr.msk.bf16.mxu1 %vm927_vm1, %v926_v0 }
 0x263   :  { %807 = vmatprep.subr.bf16.mxu1 %v926_v0 }
 0x266   :  { %808 = vmatpush3.bf16.msra.mxu1 %v975_v2 }
 0x267   :  { %821 = vmatprep.subr.bf16.mxu1 %v926_v0 }
 0x321   :  { %v159_v29 = vpop.f32.mrf.mxu1 }
 0x322   :  { %v165_v30 = vadd.f32 %v159_v29, %v117_v28 }
 0x323   :  { %v795_v31 = vpop.f32.mrf.mxu1 }
 0x324   :  { %v731_v32 = vmul.f32 -1.442695, %v165_v30  ;;  %870 = vtanh.f32 %v165_v30  ;;  %v738_v31 = vld [vmem:[%s1091_s0 + $0x10] sm:$0xff]  }
 0x325   :  { %v162_v33 = vpop.f32.mrf.mxu1 }
 0x326   :  { %872 = vpow2.f32 %v731_v32  ;;  %v342_v32 = vunpack.c.l.bf16 %v738_v31 }
 0x327   :  { %v796_v34 = vpop.f32.mrf.mxu1 }
 0x331   :  { %v871_v35 = vpop.eup %870 }
 0x332   :  { %179 = vrot.lane.b32.xlu1 %v871_v35, %s929_s21 }
 0x333   :  { %v873_v36 = vpop.eup %872 }
 0x334   :  { %v169_v37 = vadd.f32 1.0, %v873_v36 }
 0x336   :  { %874 = vrcp.f32 %v169_v37 }
 0x343   :  { %v875_v38 = vpop.eup %874 }
 0x344   :  { %174 = vrot.lane.b32.xlu0 %v875_v38, %s928_s20 }
 0x3a4   :  { %v180_v39 = vpop.permute.xlu1 %179 }
 0x3a5   :  { %v182_v41 = vmul.f32 %v875_v38, %v180_v39 }
 0x3b6   :  { %v175_v40 = vpop.permute.xlu0 %174 }
 0x3b7   :  { %v177_v42 = vmul.f32 %v175_v40, %v108_v22 }
 0x3b9   :  { %v183_v43 = vadd.f32 %v182_v41, %v177_v42 }
 0x3bb   :  { %876 = vtanh.f32 %v183_v43 }
 0x3c8   :  { %v877_v44 = vpop.eup %876 }
 0x3c9   :  { %186 = vrot.lane.b32.xlu0 %v877_v44, %s930_s22 }
 0x43b   :  { %v187_v45 = vpop.permute.xlu0 %186 }
 0x43c   :  { %v189_v46 = vmul.f32 %v875_v38, %v187_v45 }
 0x43e   :  { %v193_v47 = vpack.c.bf16 %v189_v46, %v189_v46 }
 0x440   :  { %195 = vrot.lane.b32.xlu1 %v193_v47, %s930_s22 }
 0x4b2   :  { %v196_v48 = vpop.permute.xlu1 %195 }
 0x4b3   :  { %802 = vmatmul.mubr.msk.bf16.vlgmr.msra.gmra.mxu0 %vm22_vm0, %v196_v48 }
 0x4b4   :  { %814 = vmatpush3.bf16.msra.mxu0 %v960_v1  ;;  %817 = vmatprep.mubr.msk.bf16.mxu0 %vm927_vm1, %v926_v0 }
 0x4b5   :  { %815 = vmatprep.subr.bf16.mxu0 %v926_v0 }
 0x4b8   :  { %816 = vmatpush3.bf16.msra.mxu0 %v975_v2 }
 0x4b9   :  { %829 = vmatprep.subr.bf16.mxu0 %v926_v0 }
 0x573   :  { %v234_v51 = vpop.f32.mrf.mxu0 }
 0x574   :  { %v240_v52 = vadd.f32 %v234_v51, %v192_v50 }
 0x575   :  { %v803_v53 = vpop.f32.mrf.mxu0 }
 0x576   :  { %v734_v54 = vmul.f32 -1.442695, %v240_v52  ;;  %878 = vtanh.f32 %v240_v52  ;;  %v417_v53 = vunpack.c.h.bf16 %v738_v31 }
 0x577   :  { %v237_v55 = vpop.f32.mrf.mxu0 }
 0x578   :  { %880 = vpow2.f32 %v734_v54 }
 0x579   :  { %v804_v56 = vpop.f32.mrf.mxu0 }
 0x583   :  { %v879_v57 = vpop.eup %878 }
 0x584   :  { %254 = vrot.lane.b32.xlu1 %v879_v57, %s929_s21 }
 0x585   :  { %v881_v58 = vpop.eup %880 }
 0x586   :  { %v244_v59 = vadd.f32 1.0, %v881_v58 }
 0x588   :  { %882 = vrcp.f32 %v244_v59 }
 0x595   :  { %v883_v60 = vpop.eup %882 }
 0x596   :  { %249 = vrot.lane.b32.xlu0 %v883_v60, %s928_s20 }
 0x5f6   :  { %v255_v61 = vpop.permute.xlu1 %254 }
 0x5f7   :  { %v257_v63 = vmul.f32 %v883_v60, %v255_v61 }
 0x608   :  { %v250_v62 = vpop.permute.xlu0 %249 }
 0x609   :  { %v252_v3 = vmul.f32 %v250_v62, %v183_v43 }
 0x60b   :  { %v258_v4 = vadd.f32 %v257_v63, %v252_v3 }
 0x60d   :  { %884 = vtanh.f32 %v258_v4 }
 0x61a   :  { %v885_v5 = vpop.eup %884 }
 0x61b   :  { %261 = vrot.lane.b32.xlu0 %v885_v5, %s930_s22 }
 0x68d   :  { %v262_v6 = vpop.permute.xlu0 %261 }
 0x68e   :  { %v264_v7 = vmul.f32 %v883_v60, %v262_v6 }
 0x690   :  { %v268_v8 = vpack.c.bf16 %v264_v7, %v264_v7 }
 0x692   :  { %270 = vrot.lane.b32.xlu1 %v268_v8, %s930_s22 }
 0x704   :  { %v271_v9 = vpop.permute.xlu1 %270 }
 0x705   :  { %810 = vmatmul.mubr.msk.bf16.vlgmr.msra.gmra.mxu1 %vm22_vm0, %v271_v9 }
 0x706   :  { %822 = vmatpush3.bf16.msra.mxu1 %v960_v1  ;;  %825 = vmatprep.mubr.msk.bf16.mxu1 %vm927_vm1, %v926_v0 }
 0x707   :  { %823 = vmatprep.subr.bf16.mxu1 %v926_v0 }
 0x70a   :  { %824 = vmatpush3.bf16.msra.mxu1 %v975_v2 }
 0x70b   :  { %837 = vmatprep.subr.bf16.mxu1 %v926_v0 }
 0x7c5   :  { %v309_v11 = vpop.f32.mrf.mxu1 }
 0x7c6   :  { %v315_v12 = vadd.f32 %v309_v11, %v267_v10  ;;  %v744_v11 = vld [vmem:[%s1091_s0 + $0x18] sm:$0xff]  }
 0x7c7   :  { %v811_v13 = vpop.f32.mrf.mxu1 }
 0x7c8   :  { %v737_v14 = vmul.f32 -1.442695, %v315_v12  ;;  %886 = vtanh.f32 %v315_v12  ;;  %v492_v12 = vunpack.c.l.bf16 %v744_v11 }
 0x7c9   :  { %v312_v15 = vpop.f32.mrf.mxu1 }
 0x7ca   :  { %888 = vpow2.f32 %v737_v14 }
 0x7cb   :  { %v812_v16 = vpop.f32.mrf.mxu1 }
 0x7d5   :  { %v887_v17 = vpop.eup %886 }
 0x7d6   :  { %329 = vrot.lane.b32.xlu1 %v887_v17, %s929_s21 }
 0x7d7   :  { %v889_v18 = vpop.eup %888 }
 0x7d8   :  { %v319_v19 = vadd.f32 1.0, %v889_v18 }
 0x7da   :  { %890 = vrcp.f32 %v319_v19 }
 0x7e7   :  { %v891_v20 = vpop.eup %890 }
 0x7e8   :  { %324 = vrot.lane.b32.xlu0 %v891_v20, %s928_s20 }
 0x848   :  { %v330_v21 = vpop.permute.xlu1 %329 }
 0x849   :  { %v332_v23 = vmul.f32 %v891_v20, %v330_v21 }
 0x85a   :  { %v325_v22 = vpop.permute.xlu0 %324 }
 0x85b   :  { %v327_v24 = vmul.f32 %v325_v22, %v258_v4 }
 0x85d   :  { %v333_v25 = vadd.f32 %v332_v23, %v327_v24 }
 0x85f   :  { %892 = vtanh.f32 %v333_v25 }
 0x86c   :  { %v893_v26 = vpop.eup %892 }
 0x86d   :  { %336 = vrot.lane.b32.xlu0 %v893_v26, %s930_s22 }
 0x8df   :  { %v337_v27 = vpop.permute.xlu0 %336 }
 0x8e0   :  { %v339_v28 = vmul.f32 %v891_v20, %v337_v27 }
 0x8e2   :  { %v343_v29 = vpack.c.bf16 %v339_v28, %v339_v28 }
 0x8e4   :  { %345 = vrot.lane.b32.xlu1 %v343_v29, %s930_s22 }
 0x956   :  { %v346_v30 = vpop.permute.xlu1 %345 }
 0x957   :  { %818 = vmatmul.mubr.msk.bf16.vlgmr.msra.gmra.mxu0 %vm22_vm0, %v346_v30 }
 0x958   :  { %830 = vmatpush3.bf16.msra.mxu0 %v960_v1  ;;  %833 = vmatprep.mubr.msk.bf16.mxu0 %vm927_vm1, %v926_v0 }
 0x959   :  { %831 = vmatprep.subr.bf16.mxu0 %v926_v0 }
 0x95c   :  { %832 = vmatpush3.bf16.msra.mxu0 %v975_v2 }
 0x95d   :  { %845 = vmatprep.subr.bf16.mxu0 %v926_v0 }
 0xa17   :  { %v384_v33 = vpop.f32.mrf.mxu0 }
 0xa18   :  { %v390_v34 = vadd.f32 %v384_v33, %v342_v32  ;;  %v567_v33 = vunpack.c.h.bf16 %v744_v11 }
 0xa19   :  { %v819_v35 = vpop.f32.mrf.mxu0 }
 0xa1a   :  { %v740_v36 = vmul.f32 -1.442695, %v390_v34  ;;  %894 = vtanh.f32 %v390_v34 }
 0xa1b   :  { %v387_v37 = vpop.f32.mrf.mxu0 }
 0xa1c   :  { %896 = vpow2.f32 %v740_v36 }
 0xa1d   :  { %v820_v38 = vpop.f32.mrf.mxu0 }
 0xa27   :  { %v895_v39 = vpop.eup %894 }
 0xa28   :  { %404 = vrot.lane.b32.xlu1 %v895_v39, %s929_s21 }
 0xa29   :  { %v897_v40 = vpop.eup %896 }
 0xa2a   :  { %v394_v41 = vadd.f32 1.0, %v897_v40 }
 0xa2c   :  { %898 = vrcp.f32 %v394_v41 }
 0xa39   :  { %v899_v42 = vpop.eup %898 }
 0xa3a   :  { %399 = vrot.lane.b32.xlu0 %v899_v42, %s928_s20 }
 0xa9a   :  { %v405_v43 = vpop.permute.xlu1 %404 }
 0xa9b   :  { %v407_v45 = vmul.f32 %v899_v42, %v405_v43 }
 0xaac   :  { %v400_v44 = vpop.permute.xlu0 %399 }
 0xaad   :  { %v402_v46 = vmul.f32 %v400_v44, %v333_v25 }
 0xaaf   :  { %v408_v47 = vadd.f32 %v407_v45, %v402_v46 }
 0xab1   :  { %900 = vtanh.f32 %v408_v47 }
 0xabe   :  { %v901_v48 = vpop.eup %900 }
 0xabf   :  { %411 = vrot.lane.b32.xlu0 %v901_v48, %s930_s22 }
 0xb31   :  { %v412_v49 = vpop.permute.xlu0 %411 }
 0xb32   :  { %v414_v50 = vmul.f32 %v899_v42, %v412_v49  ;;  %v860_v49 = vld [vmem:[%s1092_s2 + $0x8] sm:$0xff]  }
 0xb34   :  { %v418_v51 = vpack.c.bf16 %v414_v50, %v414_v50  ;;  %v861_v50 = vld [vmem:[%s1092_s2] sm:$0xff]  }
 0xb36   :  { %420 = vrot.lane.b32.xlu1 %v418_v51, %s930_s22 }
 0xba8   :  { %v421_v52 = vpop.permute.xlu1 %420 }
 0xba9   :  { %826 = vmatmul.mubr.msk.bf16.vlgmr.msra.gmra.mxu1 %vm22_vm0, %v421_v52 }
 0xbaa   :  { %838 = vmatpush3.bf16.msra.mxu1 %v960_v1  ;;  %841 = vmatprep.mubr.msk.bf16.mxu1 %vm927_vm1, %v926_v0 }
 0xbab   :  { %839 = vmatprep.subr.bf16.mxu1 %v926_v0 }
 0xbae   :  { %840 = vmatpush3.bf16.msra.mxu1 %v975_v2 }
 0xc69   :  { %v459_v54 = vpop.f32.mrf.mxu1 }
 0xc6a   :  { %v465_v55 = vadd.f32 %v459_v54, %v417_v53 }
 0xc6b   :  { %v827_v56 = vpop.f32.mrf.mxu1 }
 0xc6c   :  { %v743_v57 = vmul.f32 -1.442695, %v465_v55  ;;  %902 = vtanh.f32 %v465_v55 }
 0xc6d   :  { %v462_v58 = vpop.f32.mrf.mxu1 }
 0xc6e   :  { %904 = vpow2.f32 %v743_v57 }
 0xc6f   :  { %v828_v59 = vpop.f32.mrf.mxu1 }
 0xc79   :  { %v903_v60 = vpop.eup %902 }
 0xc7a   :  { %479 = vrot.lane.b32.xlu1 %v903_v60, %s929_s21 }
 0xc7b   :  { %v905_v1 = vpop.eup %904 }
 0xc7c   :  { %v469_v61 = vadd.f32 1.0, %v905_v1 }
 0xc7e   :  { %906 = vrcp.f32 %v469_v61 }
 0xc8b   :  { %v907_v62 = vpop.eup %906 }
 0xc8c   :  { %474 = vrot.lane.b32.xlu0 %v907_v62, %s928_s20 }
 0xcec   :  { %v480_v63 = vpop.permute.xlu1 %479 }
 0xced   :  { %v482_v3 = vmul.f32 %v907_v62, %v480_v63 }
 0xcfe   :  { %v475_v2 = vpop.permute.xlu0 %474 }
 0xcff   :  { %v477_v4 = vmul.f32 %v475_v2, %v408_v47 }
 0xd01   :  { %v483_v5 = vadd.f32 %v482_v3, %v477_v4 }
 0xd03   :  { %908 = vtanh.f32 %v483_v5 }
 0xd10   :  { %v909_v6 = vpop.eup %908 }
 0xd11   :  { %486 = vrot.lane.b32.xlu0 %v909_v6, %s930_s22 }
 0xd83   :  { %v487_v7 = vpop.permute.xlu0 %486 }
 0xd84   :  { %v489_v8 = vmul.f32 %v907_v62, %v487_v7 }
 0xd86   :  { %v493_v9 = vpack.c.bf16 %v489_v8, %v489_v8 }
 0xd88   :  { %495 = vrot.lane.b32.xlu1 %v493_v9, %s930_s22 }
 0xdfa   :  { %v496_v10 = vpop.permute.xlu1 %495 }
 0xdfb   :  { %834 = vmatmul.mubr.msk.bf16.vlgmr.msra.gmra.mxu0 %vm22_vm0, %v496_v10 }
 0xdfc   :  { %849 = vmatprep.mubr.msk.bf16.mxu0 %vm927_vm1, %v926_v0  ;;  %846 = vmatpush3.bf16.msra.mxu0 %v860_v49 }
 0xdfd   :  { %847 = vmatprep.subr.bf16.mxu0 %v926_v0  ;;  %v750_v0 = vld [vmem:[%s1093_s3] ss:$0 sm:$0xff] }
 0xe00   :  { %848 = vmatpush3.bf16.msra.mxu0 %v861_v50 }
 0xebb   :  { %v534_v13 = vpop.f32.mrf.mxu0 }
 0xebc   :  { %v540_v14 = vadd.f32 %v534_v13, %v492_v12 }
 0xebd   :  { %v835_v15 = vpop.f32.mrf.mxu0 }
 0xebe   :  { %v746_v16 = vmul.f32 -1.442695, %v540_v14  ;;  %910 = vtanh.f32 %v540_v14 }
 0xebf   :  { %v537_v17 = vpop.f32.mrf.mxu0 }
 0xec0   :  { %912 = vpow2.f32 %v746_v16 }
 0xec1   :  { %v836_v18 = vpop.f32.mrf.mxu0 }
 0xecb   :  { %v911_v19 = vpop.eup %910 }
 0xecc   :  { %554 = vrot.lane.b32.xlu1 %v911_v19, %s929_s21 }
 0xecd   :  { %v913_v20 = vpop.eup %912 }
 0xece   :  { %v544_v21 = vadd.f32 1.0, %v913_v20 }
 0xed0   :  { %914 = vrcp.f32 %v544_v21 }
 0xedd   :  { %v915_v22 = vpop.eup %914 }
 0xede   :  { %549 = vrot.lane.b32.xlu0 %v915_v22, %s928_s20 }
 0xf3e   :  { %v555_v23 = vpop.permute.xlu1 %554 }
 0xf3f   :  { %v557_v25 = vmul.f32 %v915_v22, %v555_v23 }
 0xf50   :  { %v550_v24 = vpop.permute.xlu0 %549 }
 0xf51   :  { %v552_v26 = vmul.f32 %v550_v24, %v483_v5 }
 0xf53   :  { %v558_v27 = vadd.f32 %v557_v25, %v552_v26 }
 0xf55   :  { %916 = vtanh.f32 %v558_v27 }
 0xf62   :  { %v917_v28 = vpop.eup %916 }
 0xf63   :  { %561 = vrot.lane.b32.xlu0 %v917_v28, %s930_s22 }
 0xfd5   :  { %v562_v29 = vpop.permute.xlu0 %561 }
 0xfd6   :  { %v564_v30 = vmul.f32 %v915_v22, %v562_v29 }
 0xfd8   :  { %v568_v31 = vpack.c.bf16 %v564_v30, %v564_v30 }
 0xfda   :  { %570 = vrot.lane.b32.xlu1 %v568_v31, %s930_s22 }
0x104c   :  { %v571_v32 = vpop.permute.xlu1 %570 }
0x104d   :  { %842 = vmatmul.mubr.msk.bf16.vlgmr.msra.gmra.mxu1 %vm22_vm0, %v571_v32 }
0x110d   :  { %v609_v34 = vpop.f32.mrf.mxu1 }
0x110e   :  { %v615_v35 = vadd.f32 %v609_v34, %v567_v33 }
0x110f   :  { %v843_v36 = vpop.f32.mrf.mxu1 }
0x1110   :  { %v749_v37 = vmul.f32 -1.442695, %v615_v35  ;;  %918 = vtanh.f32 %v615_v35 }
0x1111   :  { %v612_v38 = vpop.f32.mrf.mxu1 }
0x1112   :  { %920 = vpow2.f32 %v749_v37 }
0x1113   :  { %v844_v39 = vpop.f32.mrf.mxu1 }
0x111d   :  { %v919_v40 = vpop.eup %918 }
0x111e   :  { %629 = vrot.lane.b32.xlu1 %v919_v40, %s929_s21 }
0x111f   :  { %v921_v41 = vpop.eup %920 }
0x1120   :  { %v619_v42 = vadd.f32 1.0, %v921_v41 }
0x1122   :  { %922 = vrcp.f32 %v619_v42 }
0x112f   :  { %v923_v43 = vpop.eup %922 }
0x1130   :  { %624 = vrot.lane.b32.xlu0 %v923_v43, %s928_s20 }
0x1190   :  { %v630_v44 = vpop.permute.xlu1 %629 }
0x1191   :  { %v632_v46 = vmul.f32 %v923_v43, %v630_v44 }
0x11a2   :  { %v625_v45 = vpop.permute.xlu0 %624 }
0x11a3   :  { %v627_v47 = vmul.f32 %v625_v45, %v558_v27 }
0x11a5   :  { %v633_v48 = vadd.f32 %v632_v46, %v627_v47 }
0x11a7   :  { %924 = vtanh.f32 %v633_v48  ;;  %645 = vst.msk [vmem:[#allocation3] sm:$0xff] %vm22_vm0, %v633_v48 }
0x11b4   :  { %v925_v51 = vpop.eup %924 }
0x11b5   :  { %636 = vrot.lane.b32.xlu0 %v925_v51, %s930_s22 }
0x1227   :  { %v637_v52 = vpop.permute.xlu0 %636 }
0x1228   :  { %v639_v53 = vmul.f32 %v923_v43, %v637_v52 }
0x122a   :  { %v649_v54 = vpack.c.bf16 %v639_v53, %v639_v53  ;;  %641 = vrot.lane.b32.xlu0 %v639_v53, %s930_s22 }
0x122c   :  { %662 = vrot.lane.b32.xlu1 %v649_v54, %s930_s22 }
0x129c   :  { %v642_v55 = vpop.permute.xlu0 %641 }
0x129d   :  { %644 = vst.msk [vmem:[#allocation2] sm:$0xff] %vm22_vm0, %v642_v55 }
0x129e   :  { %v663_v56 = vpop.permute.xlu1 %662 }
0x129f   :  { %850 = vmatmul.mubr.msk.bf16.vlgmr.msra.gmra.mxu0 %vm22_vm0, %v663_v56 }
0x135f   :  { %v713_v57 = vpop.f32.mrf.mxu0 }
0x1360   :  { %v714_v58 = vadd.f32 %v750_v0, %v713_v57 }
0x1361   :  { %v851_v59 = vpop.f32.mrf.mxu0 }
0x1362   :  { %720 = vst.msk [vmem:[%s1094_s4] sm:$0xff] %vm719_vm2, %v714_v58 }
0x1363   :  { %v716_v60 = vpop.f32.mrf.mxu0 }
0x1365   :  { %v852_v1 = vpop.f32.mrf.mxu0 }

</bundles_post_ra>
